<compile_context>
chip_gen: v7x
topology: tpu7x:2x2x1
jax: 0.10.0
libtpu: 0.0.40
codegen_flags: <defaults>
</compile_context>

<pallas_src>
import jax
import jax.numpy as jnp
from jax.experimental import pallas as pl
from jax.experimental.pallas import tpu as pltpu

EPS = 1e-5
NEG_SLOPE = 0.01
LANE = 128
NEG_BIG = -1e30  # padded-class logit -> exp underflows to exactly 0


def _round_up(x, m):
    return ((x + m - 1) // m) * m


def _leaky_relu(x):
    return jnp.where(x > 0, x, NEG_SLOPE * x)


# --------------------------------------------------------------------------- #
# Kernel
# --------------------------------------------------------------------------- #
def simple_dnn_kernel(
    x_ref,
    w1_ref, b1_ref,
    w2_ref, b2_ref,
    w3_ref, b3_ref,
    w4_ref, b4_ref,
    w5_ref, b5_ref,
    out_ref,
):
    # x arrives as f32 (no wrapper-side cast pass); cast to bf16 for the MXU here.
    h = x_ref[...].astype(jnp.bfloat16)  # [TILE_B, D]

    # Hidden blocks: (BN-folded) Linear -> LeakyReLU -> (Dropout = identity).
    for w_ref, b_ref in ((w1_ref, b1_ref), (w2_ref, b2_ref),
                         (w3_ref, b3_ref), (w4_ref, b4_ref)):
        acc = jnp.dot(h, w_ref[...], preferred_element_type=jnp.float32)
        acc = acc + b_ref[...]                      # f32 bias (BN folded in)
        h = _leaky_relu(acc).astype(jnp.bfloat16)   # bf16 feed to next MXU pass

    # Classifier + softmax over the (lane-padded) class axis.
    logits = jnp.dot(h, w5_ref[...], preferred_element_type=jnp.float32)
    logits = logits + b5_ref[...]                   # f32; padded classes get -1e30
    mx = jnp.max(logits, axis=1, keepdims=True)
    e = jnp.exp(logits - mx)
    denom = jnp.sum(e, axis=1, keepdims=True)
    inv = pl.reciprocal(denom, approx=True)         # EUP slot, ~free
    out_ref[...] = (e * inv).astype(out_ref.dtype)  # bf16 lane-dense store


# --------------------------------------------------------------------------- #
# Wrapper
# --------------------------------------------------------------------------- #
def simple_dnn_forward(x, folded_params, *, tile_b=2048):
    """Fused forward pass.

    x: [B, input_dim] f32. folded_params: [w1,b1,...,w5,b5] (BN folded, padded).
    Returns the padded bf16 block [b_pad, 128]; the consumer slices
    [:B, :num_classes] lazily (or fuses argmax/top-k on the padded block) so the
    kernel's jit does not pay an extra full-output HBM pass.
    """
    B, D = x.shape
    b16 = _round_up(B, 16)                       # bf16 packs 16 rows per sublane group
    tile_b = max(16, min((tile_b // 16) * 16, b16))
    # v7x has 2 TensorCores sharded over the "parallel" batch axis: keep >= 2
    # grid steps whenever the batch is big enough so neither core idles.
    if tile_b >= b16 and b16 >= 32:
        tile_b = _round_up((b16 + 1) // 2, 16)
    b_pad = _round_up(B, tile_b)
    if b_pad != B:
        x = jnp.pad(x, ((0, b_pad - B), (0, 0)))

    out_width = folded_params[-1].shape[-1]      # lane-padded classifier width (128)
    grid = (b_pad // tile_b,)

    # x streams through double-buffered DMA as f32 (cast to bf16 in-kernel).
    x_spec = pl.BlockSpec((tile_b, D), lambda i: (i, 0))
    # Weights & biases: full-array blocks, constant index_map -> resident in VMEM.
    # Grid-invariant, so a single buffer suffices (no double-buffer allocation).
    param_specs = [
        pl.BlockSpec(p.shape, lambda i: (0, 0), pipeline_mode=pl.Buffered(1))
        for p in folded_params
    ]
    out_spec = pl.BlockSpec((tile_b, out_width), lambda i: (i, 0))

    # Footprint: ~tile_b*(64*4 + 2*128*2) bytes of activations (double-buffered)
    # + ~200 KiB weights; 32 MiB limit only needed for the biggest tiles.
    vmem_limit = (32 << 20) if tile_b >= 2048 else (16 << 20)

    out = pl.pallas_call(
        simple_dnn_kernel,
        out_shape=jax.ShapeDtypeStruct((b_pad, out_width), jnp.bfloat16),
        grid=grid,
        in_specs=[x_spec] + param_specs,
        out_specs=out_spec,
        compiler_params=pltpu.CompilerParams(
            dimension_semantics=("parallel",),   # shard batch tiles across v7x's 2 TCs
            vmem_limit_bytes=vmem_limit,
        ),
    )(x, *folded_params)
    return out


# --------------------------------------------------------------------------- #
# Parameter setup (wrapper side, once)
# --------------------------------------------------------------------------- #
def init_params(key, input_dim, num_classes):
    """Deterministic raw params (PyTorch-style init). Linear weights are [in, out]."""
    dims = [input_dim, 256, 128, 64, 32, num_classes]
    params = []
    keys = jax.random.split(key, 10)
    k_idx = 0
    for layer in range(5):
        d_in, d_out = dims[layer], dims[layer + 1]
        bound = 1.0 / jnp.sqrt(d_in)
        w = jax.random.uniform(keys[k_idx], (d_in, d_out), jnp.float32, -bound, bound)
        k_idx += 1
        b = jax.random.uniform(keys[k_idx], (1, d_out), jnp.float32, -bound, bound)
        k_idx += 1
        params.extend([w, b])
        if layer < 4:
            # BatchNorm1d: gamma=1, beta=0, running_mean=0, running_var=1
            params.extend([jnp.ones((1, d_out), jnp.float32),
                           jnp.zeros((1, d_out), jnp.float32),
                           jnp.zeros((1, d_out), jnp.float32),
                           jnp.ones((1, d_out), jnp.float32)])
    return params


def fold_and_pad_params(params):
    """Fold eval-mode BN into Linear, lane-pad outputs to 128, cast weights to bf16.

    The input feature dim (K=64 here) is intentionally NOT padded: padding K only
    adds input DMA bytes without useful FLOPs.
    """
    p = list(params)
    folded = []
    prev_pad = 0  # lane padding added to this layer's input by the previous layer
    for layer in range(5):
        if layer < 4:
            w, b, g, be, m, v = p[:6]
            p = p[6:]
            scale = g * jax.lax.rsqrt(v + EPS)        # (1, d_out)
            w_f = w * scale
            b_f = (b - m) * scale + be
        else:
            w_f, b_f = p[0], p[1]
        d_in, d_out = w_f.shape
        d_out_pad = _round_up(d_out, LANE)
        col_pad = d_out_pad - d_out
        # zero-pad extra input rows (match previous layer's padding) + output cols
        w_f = jnp.pad(w_f, ((0, prev_pad), (0, col_pad)))
        pad_bias = 0.0 if layer < 4 else NEG_BIG      # kill padded classes in softmax
        b_f = jnp.pad(b_f, ((0, 0), (0, col_pad)), constant_values=pad_bias)
        folded.append(w_f.astype(jnp.bfloat16))
        folded.append(b_f.astype(jnp.float32))
        prev_pad = col_pad
    return folded


def reference_forward(x, params):
    """Pure-JAX f32 reference of the same eval-mode forward pass (unfolded params)."""
    p = list(params)
    h = x
    for _ in range(4):
        w, b, g, be, m, v = p[:6]
        p = p[6:]
        h = h @ w + b
        h = (h - m) * jax.lax.rsqrt(v + EPS) * g + be
        h = jnp.where(h > 0, h, NEG_SLOPE * h)
    w, b = p
    return jax.nn.softmax(h @ w + b, axis=1)


if __name__ == "__main__":
    B, INPUT_DIM, NUM_CLASSES = 8, 64, 16

    key = jax.random.PRNGKey(0)
    kx, kp = jax.random.split(key)
    x = jax.random.normal(kx, (B, INPUT_DIM), dtype=jnp.float32)
    raw_params = init_params(kp, INPUT_DIM, NUM_CLASSES)
    folded_params = fold_and_pad_params(raw_params)

    fwd = jax.jit(simple_dnn_forward)
    out_padded = jax.block_until_ready(fwd(x, folded_params))

    # Padded block: batch rounded to 16 (bf16 packing), classes lane-padded to 128.
    assert out_padded.shape == (_round_up(B, 16), 128), out_padded.shape
    assert out_padded.dtype == jnp.bfloat16

    # Consumer-side (lazy) slice back to the module's output shape for verification.
    out = jnp.asarray(out_padded[:B, :NUM_CLASSES], jnp.float32)

    ref = reference_forward(x, raw_params)
    assert out.shape == (B, NUM_CLASSES), out.shape
    # bf16 matmul operands + bf16 output vs f32 reference -> loosened tolerance.
    assert jnp.allclose(out, ref, atol=2e-2, rtol=2e-2), "mismatch vs reference"
    # approx reciprocal + bf16 output: rows sum to 1 only to ~1e-2.
    assert jnp.allclose(jnp.sum(out, axis=1), 1.0, atol=2e-2), "softmax rows must sum to ~1"

    print("KERNEL_OK")
</pallas_src>

<mosaic_0001>
module attributes {stable_mosaic.version = 11 : i64} {
  func.func @simple_dnn_kernel(%arg0: i32, %arg1: memref<16x64xf32, #tpu.memory_space<vmem>>, %arg2: memref<64x256xbf16, #tpu.memory_space<vmem>>, %arg3: memref<1x256xf32, #tpu.memory_space<vmem>>, %arg4: memref<256x128xbf16, #tpu.memory_space<vmem>>, %arg5: memref<1x128xf32, #tpu.memory_space<vmem>>, %arg6: memref<128x128xbf16, #tpu.memory_space<vmem>>, %arg7: memref<1x128xf32, #tpu.memory_space<vmem>>, %arg8: memref<128x128xbf16, #tpu.memory_space<vmem>>, %arg9: memref<1x128xf32, #tpu.memory_space<vmem>>, %arg10: memref<128x128xbf16, #tpu.memory_space<vmem>>, %arg11: memref<1x128xf32, #tpu.memory_space<vmem>>, %arg12: memref<16x128xbf16, #tpu.memory_space<vmem>>) attributes {dimension_semantics = [#tpu.dimension_semantics<parallel>], iteration_bounds = array<i64: 1>, scalar_prefetch = 0 : i64, scratch_operands = 0 : i64, tpu.core_type = #tpu.core_type<tc>, window_params = [{transform_indices = @transform_0, window_bounds = array<i64: 16, 64>}, {pipeline_mode = #tpu.pipeline_mode<synchronous>, transform_indices = @transform_1, window_bounds = array<i64: 64, 256>}, {pipeline_mode = #tpu.pipeline_mode<synchronous>, transform_indices = @transform_2, window_bounds = array<i64: 1, 256>}, {pipeline_mode = #tpu.pipeline_mode<synchronous>, transform_indices = @transform_3, window_bounds = array<i64: 256, 128>}, {pipeline_mode = #tpu.pipeline_mode<synchronous>, transform_indices = @transform_4, window_bounds = array<i64: 1, 128>}, {pipeline_mode = #tpu.pipeline_mode<synchronous>, transform_indices = @transform_5, window_bounds = array<i64: 128, 128>}, {pipeline_mode = #tpu.pipeline_mode<synchronous>, transform_indices = @transform_6, window_bounds = array<i64: 1, 128>}, {pipeline_mode = #tpu.pipeline_mode<synchronous>, transform_indices = @transform_7, window_bounds = array<i64: 128, 128>}, {pipeline_mode = #tpu.pipeline_mode<synchronous>, transform_indices = @transform_8, window_bounds = array<i64: 1, 128>}, {pipeline_mode = #tpu.pipeline_mode<synchronous>, transform_indices = @transform_9, window_bounds = array<i64: 128, 128>}, {pipeline_mode = #tpu.pipeline_mode<synchronous>, transform_indices = @transform_10, window_bounds = array<i64: 1, 128>}, {transform_indices = @transform_11, window_bounds = array<i64: 16, 128>}]} {
    %c0 = arith.constant 0 : index
    %c0_0 = arith.constant 0 : index
    %0 = vector.load %arg1[%c0, %c0_0] : memref<16x64xf32, #tpu.memory_space<vmem>>, vector<16x64xf32>
    %1 = arith.truncf %0 : vector<16x64xf32> to vector<16x64xbf16>
    %c0_1 = arith.constant 0 : index
    %c0_2 = arith.constant 0 : index
    %2 = vector.load %arg2[%c0_1, %c0_2] : memref<64x256xbf16, #tpu.memory_space<vmem>>, vector<64x256xbf16>
    %cst = arith.constant dense<0.000000e+00> : vector<16x256xf32>
    %3 = tpu.matmul %1, %2, %cst {dimension_numbers = #tpu.dot_dimension_numbers<[1], [0], [0], [1], [0, 0, 1, 1], [], []>} : vector<16x64xbf16>, vector<64x256xbf16>, vector<16x256xf32> -> vector<16x256xf32>
    %c0_3 = arith.constant 0 : index
    %c0_4 = arith.constant 0 : index
    %4 = vector.load %arg3[%c0_3, %c0_4] : memref<1x256xf32, #tpu.memory_space<vmem>>, vector<1x256xf32>
    %5 = vector.broadcast %4 : vector<1x256xf32> to vector<16x256xf32>
    %6 = arith.addf %3, %5 : vector<16x256xf32>
    %cst_5 = arith.constant 0.000000e+00 : f32
    %7 = vector.broadcast %cst_5 : f32 to vector<16x256xf32>
    %8 = arith.cmpf ogt, %6, %7 : vector<16x256xf32>
    %cst_6 = arith.constant 0.00999999977 : f32
    %9 = vector.broadcast %cst_6 : f32 to vector<16x256xf32>
    %10 = arith.mulf %9, %6 : vector<16x256xf32>
    %11 = arith.select %8, %6, %10 : vector<16x256xi1>, vector<16x256xf32>
    %12 = arith.truncf %11 : vector<16x256xf32> to vector<16x256xbf16>
    %c0_7 = arith.constant 0 : index
    %c0_8 = arith.constant 0 : index
    %13 = vector.load %arg4[%c0_7, %c0_8] : memref<256x128xbf16, #tpu.memory_space<vmem>>, vector<256x128xbf16>
    %cst_9 = arith.constant dense<0.000000e+00> : vector<16x128xf32>
    %14 = tpu.matmul %12, %13, %cst_9 {dimension_numbers = #tpu.dot_dimension_numbers<[1], [0], [0], [1], [0, 0, 1, 1], [], []>} : vector<16x256xbf16>, vector<256x128xbf16>, vector<16x128xf32> -> vector<16x128xf32>
    %c0_10 = arith.constant 0 : index
    %c0_11 = arith.constant 0 : index
    %15 = vector.load %arg5[%c0_10, %c0_11] : memref<1x128xf32, #tpu.memory_space<vmem>>, vector<1x128xf32>
    %16 = vector.broadcast %15 : vector<1x128xf32> to vector<16x128xf32>
    %17 = arith.addf %14, %16 : vector<16x128xf32>
    %cst_12 = arith.constant 0.000000e+00 : f32
    %18 = vector.broadcast %cst_12 : f32 to vector<16x128xf32>
    %19 = arith.cmpf ogt, %17, %18 : vector<16x128xf32>
    %cst_13 = arith.constant 0.00999999977 : f32
    %20 = vector.broadcast %cst_13 : f32 to vector<16x128xf32>
    %21 = arith.mulf %20, %17 : vector<16x128xf32>
    %22 = arith.select %19, %17, %21 : vector<16x128xi1>, vector<16x128xf32>
    %23 = arith.truncf %22 : vector<16x128xf32> to vector<16x128xbf16>
    %c0_14 = arith.constant 0 : index
    %c0_15 = arith.constant 0 : index
    %24 = vector.load %arg6[%c0_14, %c0_15] : memref<128x128xbf16, #tpu.memory_space<vmem>>, vector<128x128xbf16>
    %cst_16 = arith.constant dense<0.000000e+00> : vector<16x128xf32>
    %25 = tpu.matmul %23, %24, %cst_16 {dimension_numbers = #tpu.dot_dimension_numbers<[1], [0], [0], [1], [0, 0, 1, 1], [], []>} : vector<16x128xbf16>, vector<128x128xbf16>, vector<16x128xf32> -> vector<16x128xf32>
    %c0_17 = arith.constant 0 : index
    %c0_18 = arith.constant 0 : index
    %26 = vector.load %arg7[%c0_17, %c0_18] : memref<1x128xf32, #tpu.memory_space<vmem>>, vector<1x128xf32>
    %27 = vector.broadcast %26 : vector<1x128xf32> to vector<16x128xf32>
    %28 = arith.addf %25, %27 : vector<16x128xf32>
    %cst_19 = arith.constant 0.000000e+00 : f32
    %29 = vector.broadcast %cst_19 : f32 to vector<16x128xf32>
    %30 = arith.cmpf ogt, %28, %29 : vector<16x128xf32>
    %cst_20 = arith.constant 0.00999999977 : f32
    %31 = vector.broadcast %cst_20 : f32 to vector<16x128xf32>
    %32 = arith.mulf %31, %28 : vector<16x128xf32>
    %33 = arith.select %30, %28, %32 : vector<16x128xi1>, vector<16x128xf32>
    %34 = arith.truncf %33 : vector<16x128xf32> to vector<16x128xbf16>
    %c0_21 = arith.constant 0 : index
    %c0_22 = arith.constant 0 : index
    %35 = vector.load %arg8[%c0_21, %c0_22] : memref<128x128xbf16, #tpu.memory_space<vmem>>, vector<128x128xbf16>
    %cst_23 = arith.constant dense<0.000000e+00> : vector<16x128xf32>
    %36 = tpu.matmul %34, %35, %cst_23 {dimension_numbers = #tpu.dot_dimension_numbers<[1], [0], [0], [1], [0, 0, 1, 1], [], []>} : vector<16x128xbf16>, vector<128x128xbf16>, vector<16x128xf32> -> vector<16x128xf32>
    %c0_24 = arith.constant 0 : index
    %c0_25 = arith.constant 0 : index
    %37 = vector.load %arg9[%c0_24, %c0_25] : memref<1x128xf32, #tpu.memory_space<vmem>>, vector<1x128xf32>
    %38 = vector.broadcast %37 : vector<1x128xf32> to vector<16x128xf32>
    %39 = arith.addf %36, %38 : vector<16x128xf32>
    %cst_26 = arith.constant 0.000000e+00 : f32
    %40 = vector.broadcast %cst_26 : f32 to vector<16x128xf32>
    %41 = arith.cmpf ogt, %39, %40 : vector<16x128xf32>
    %cst_27 = arith.constant 0.00999999977 : f32
    %42 = vector.broadcast %cst_27 : f32 to vector<16x128xf32>
    %43 = arith.mulf %42, %39 : vector<16x128xf32>
    %44 = arith.select %41, %39, %43 : vector<16x128xi1>, vector<16x128xf32>
    %45 = arith.truncf %44 : vector<16x128xf32> to vector<16x128xbf16>
    %c0_28 = arith.constant 0 : index
    %c0_29 = arith.constant 0 : index
    %46 = vector.load %arg10[%c0_28, %c0_29] : memref<128x128xbf16, #tpu.memory_space<vmem>>, vector<128x128xbf16>
    %cst_30 = arith.constant dense<0.000000e+00> : vector<16x128xf32>
    %47 = tpu.matmul %45, %46, %cst_30 {dimension_numbers = #tpu.dot_dimension_numbers<[1], [0], [0], [1], [0, 0, 1, 1], [], []>} : vector<16x128xbf16>, vector<128x128xbf16>, vector<16x128xf32> -> vector<16x128xf32>
    %c0_31 = arith.constant 0 : index
    %c0_32 = arith.constant 0 : index
    %48 = vector.load %arg11[%c0_31, %c0_32] : memref<1x128xf32, #tpu.memory_space<vmem>>, vector<1x128xf32>
    %49 = vector.broadcast %48 : vector<1x128xf32> to vector<16x128xf32>
    %50 = arith.addf %47, %49 : vector<16x128xf32>
    %cst_33 = arith.constant dense<0xFF800000> : vector<16xf32>
    %51 = vector.multi_reduction <maximumf>, %50, %cst_33 [1] : vector<16x128xf32> to vector<16xf32>
    %52 = vector.shape_cast %51 : vector<16xf32> to vector<16x1xf32>
    %53 = vector.broadcast %52 : vector<16x1xf32> to vector<16x128xf32>
    %54 = arith.subf %50, %53 : vector<16x128xf32>
    %55 = math.exp %54 : vector<16x128xf32>
    %cst_34 = arith.constant dense<0.000000e+00> : vector<16xf32>
    %56 = vector.multi_reduction <add>, %55, %cst_34 [1] : vector<16x128xf32> to vector<16xf32>
    %57 = vector.shape_cast %56 : vector<16xf32> to vector<16x1xf32>
    %58 = tpu.reciprocal %57 {approx = true} : vector<16x1xf32> -> vector<16x1xf32>
    %59 = vector.broadcast %58 : vector<16x1xf32> to vector<16x128xf32>
    %60 = arith.mulf %55, %59 : vector<16x128xf32>
    %61 = arith.truncf %60 : vector<16x128xf32> to vector<16x128xbf16>
    %c0_35 = arith.constant 0 : index
    %c0_36 = arith.constant 0 : index
    %62 = vector.load %arg12[%c0_35, %c0_36] : memref<16x128xbf16, #tpu.memory_space<vmem>>, vector<16x128xbf16>
    tpu.vector_store %arg12[%c0_35, %c0_36], %61 {strides = array<i32>} : memref<16x128xbf16, #tpu.memory_space<vmem>>, vector<16x128xbf16>,
    return
  }
  func.func @transform_0(%arg0: i32) -> (i32, i32) {
    %c0_i32 = arith.constant 0 : i32
    %c0_i32_0 = arith.constant 0 : i32
    return %arg0, %c0_i32 : i32, i32
  }
  func.func @transform_1(%arg0: i32) -> (i32, i32) {
    %c0_i32 = arith.constant 0 : i32
    %c0_i32_0 = arith.constant 0 : i32
    %c0_i32_1 = arith.constant 0 : i32
    return %c0_i32, %c0_i32_0 : i32, i32
  }
  func.func @transform_2(%arg0: i32) -> (i32, i32) {
    %c0_i32 = arith.constant 0 : i32
    %c0_i32_0 = arith.constant 0 : i32
    %c0_i32_1 = arith.constant 0 : i32
    return %c0_i32, %c0_i32_0 : i32, i32
  }
  func.func @transform_3(%arg0: i32) -> (i32, i32) {
    %c0_i32 = arith.constant 0 : i32
    %c0_i32_0 = arith.constant 0 : i32
    %c0_i32_1 = arith.constant 0 : i32
    return %c0_i32, %c0_i32_0 : i32, i32
  }
  func.func @transform_4(%arg0: i32) -> (i32, i32) {
    %c0_i32 = arith.constant 0 : i32
    %c0_i32_0 = arith.constant 0 : i32
    %c0_i32_1 = arith.constant 0 : i32
    return %c0_i32, %c0_i32_0 : i32, i32
  }
  func.func @transform_5(%arg0: i32) -> (i32, i32) {
    %c0_i32 = arith.constant 0 : i32
    %c0_i32_0 = arith.constant 0 : i32
    %c0_i32_1 = arith.constant 0 : i32
    return %c0_i32, %c0_i32_0 : i32, i32
  }
  func.func @transform_6(%arg0: i32) -> (i32, i32) {
    %c0_i32 = arith.constant 0 : i32
    %c0_i32_0 = arith.constant 0 : i32
    %c0_i32_1 = arith.constant 0 : i32
    return %c0_i32, %c0_i32_0 : i32, i32
  }
  func.func @transform_7(%arg0: i32) -> (i32, i32) {
    %c0_i32 = arith.constant 0 : i32
    %c0_i32_0 = arith.constant 0 : i32
    %c0_i32_1 = arith.constant 0 : i32
    return %c0_i32, %c0_i32_0 : i32, i32
  }
  func.func @transform_8(%arg0: i32) -> (i32, i32) {
    %c0_i32 = arith.constant 0 : i32
    %c0_i32_0 = arith.constant 0 : i32
    %c0_i32_1 = arith.constant 0 : i32
    return %c0_i32, %c0_i32_0 : i32, i32
  }
  func.func @transform_9(%arg0: i32) -> (i32, i32) {
    %c0_i32 = arith.constant 0 : i32
    %c0_i32_0 = arith.constant 0 : i32
    %c0_i32_1 = arith.constant 0 : i32
    return %c0_i32, %c0_i32_0 : i32, i32
  }
  func.func @transform_10(%arg0: i32) -> (i32, i32) {
    %c0_i32 = arith.constant 0 : i32
    %c0_i32_0 = arith.constant 0 : i32
    %c0_i32_1 = arith.constant 0 : i32
    return %c0_i32, %c0_i32_0 : i32, i32
  }
  func.func @transform_11(%arg0: i32) -> (i32, i32) {
    %c0_i32 = arith.constant 0 : i32
    %c0_i32_0 = arith.constant 0 : i32
    return %arg0, %c0_i32 : i32, i32
  }
}

</mosaic_0001>

<bundles_post_ra>
// kernel: simple_dnn_forward.1
= control target key start
LH: loop header
LB: loop body
LE: loop exit
PB: predicated region body
PF: predicated region fallthrough
CT: control target
= control target key end

     0   :  { %16 = vsyncpa [#allocation3], 0  ;;  %s1407_s0 = inlined_call_operand.vmem [shape: f32[16,64], index: 0, kind: input, shape index: {}]   ;;  %s1408_s1 = inlined_call_operand.hbm [shape: bf16[64,256], index: 1, kind: input, shape index: {}]   ;;  %s1409_s2 = inlined_call_operand.vmem [shape: f32[1,256], index: 2, kind: input, shape index: {}]   ;;  %s1410_s3 = inlined_call_operand.hbm [shape: bf16[256,128], index: 3, kind: input, shape index: {}]   ;;  %s1411_s4 = inlined_call_operand.vmem [shape: f32[1,128], index: 4, kind: input, shape index: {}]   ;;  %s1412_s5 = inlined_call_operand.hbm [shape: bf16[128,128], index: 5, kind: input, shape index: {}]   ;;  %s1413_s6 = inlined_call_operand.vmem [shape: f32[1,128], index: 6, kind: input, shape index: {}]   ;;  %s1414_s7 = inlined_call_operand.hbm [shape: bf16[128,128], index: 7, kind: input, shape index: {}]   ;;  %s1415_s8 = inlined_call_operand.vmem [shape: f32[1,128], index: 8, kind: input, shape index: {}]   ;;  %s1416_s9 = inlined_call_operand.hbm [shape: bf16[128,128], index: 9, kind: input, shape index: {}]   ;;  %s1417_s10 = inlined_call_operand.vmem [shape: f32[1,128], index: 10, kind: input, shape index: {}]   ;;  %s1418_s11 = inlined_call_operand.hbm [shape: bf16[16,128], index: 11, kind: output, shape index: {}]  }
   0x1   :  { %17 = vsyncpa [#allocation6], 0 }
   0x2   :  { %18 = vsyncpa [#allocation9], 0 }
   0x3   :  { %19 = vsyncpa [#allocation4], 0  ;;  %s1196_s17 = smov [#allocation5]   ;;  %s1056_s21 = scalar_lea.hbm %s1410_s3, 2048 }
   0x4   :  { %s41_s18 = sshll.u32 %s1196_s17, 4  ;;  %p1057_p0 = scmp.ne.s32.totalorder %s1410_s3, %s1056_s21  ;;  %s42_s18 = int_to_ptr.vmem [resolvable:$true] %s41_s18 }
   0x5   :  { %p1060_p1 = scmp.lt.u32.totalorder %s1056_s21, %s1410_s3 }
   0x7   :  { %p1062_p2 = pnand %p1060_p1, %p1057_p0 }
   0x9   :  { %1065 = shalt.err (!%p1062_p2)
}
   0xa   :  { %s1066_s26 = scalar_lea.vmem %s42_s18, 2048  ;;  %p1071_p4 = scmp.lt.s32.totalorder %s42_s18, %s42_s18 }
   0xb   :  { %p1067_p3 = scmp.ne.s32.totalorder %s42_s18, %s1066_s26  ;;  %p1072_p5 = scmp.lt.s32.totalorder %s1066_s26, %s1066_s26 }
   0xd   :  { %p1073_p6 = por %p1072_p5, %p1071_p4 }
   0xf   :  { %p1074_p7 = pnand %p1073_p6, %p1067_p3 }
  0x11   :  { %1077 = shalt.err (!%p1074_p7)
}
  0x12   :  { %s1197_s27 = smov 64   ;;  %s1198_s28 = smov 4  }
  0x13   :  { %47 = dma.hbm_to_vmem [thread:$0]  %s1410_s3, 2048, %s42_s18, [#allocation6], %s1197_s27, %s1197_s27, %s1198_s28  }
  0x14   :  { %s1199_s12 = smov [#allocation8]   ;;  %s1200_s14 = smov [#allocation2]  }
  0x15   :  { %s69_s13 = sshll.u32 %s1199_s12, 4  ;;  %s27_s15 = sshll.u32 %s1200_s14, 4  ;;  %s70_s13 = int_to_ptr.vmem [resolvable:$true] %s69_s13  ;;  %s28_s15 = int_to_ptr.vmem [resolvable:$true] %s27_s15 }
  0x16   :  { %s1078_s19 = scalar_lea.hbm %s1414_s7, 1024 }
  0x17   :  { %p1079_p8 = scmp.ne.s32.totalorder %s1414_s7, %s1078_s19  ;;  %p1082_p9 = scmp.lt.u32.totalorder %s1078_s19, %s1414_s7 }
  0x19   :  { %p1084_p10 = pnand %p1082_p9, %p1079_p8 }
  0x1b   :  { %1087 = shalt.err (!%p1084_p10)
}
  0x1c   :  { %s1088_s3 = scalar_lea.vmem %s70_s13, 1024  ;;  %p1093_p12 = scmp.lt.s32.totalorder %s70_s13, %s70_s13 }
  0x1d   :  { %p1089_p11 = scmp.ne.s32.totalorder %s70_s13, %s1088_s3  ;;  %p1094_p13 = scmp.lt.s32.totalorder %s1088_s3, %s1088_s3 }
  0x1f   :  { %p1095_p0 = por %p1094_p13, %p1093_p12 }
  0x21   :  { %p1096_p1 = pnand %p1095_p0, %p1089_p11 }
  0x23   :  { %1099 = shalt.err (!%p1096_p1)
}
  0x24   :  { %75 = dma.hbm_to_vmem [thread:$0]  %s1414_s7, 1024, %s70_s13, [#allocation9], %s1197_s27, %s1197_s27, %s1198_s28  }
  0x25   :  { %s1100_s29 = scalar_lea.hbm %s1408_s1, 1024 }
  0x26   :  { %p1101_p2 = scmp.ne.s32.totalorder %s1408_s1, %s1100_s29  ;;  %p1104_p3 = scmp.lt.u32.totalorder %s1100_s29, %s1408_s1 }
  0x28   :  { %p1106_p4 = pnand %p1104_p3, %p1101_p2 }
  0x2a   :  { %1109 = shalt.err (!%p1106_p4)
}
  0x2b   :  { %s1110_s17 = scalar_lea.vmem %s28_s15, 1024  ;;  %p1115_p6 = scmp.lt.s32.totalorder %s28_s15, %s28_s15 }
  0x2c   :  { %p1111_p5 = scmp.ne.s32.totalorder %s28_s15, %s1110_s17  ;;  %p1116_p7 = scmp.lt.s32.totalorder %s1110_s17, %s1110_s17 }
  0x2e   :  { %p1117_p8 = por %p1116_p7, %p1115_p6 }
  0x30   :  { %p1118_p9 = pnand %p1117_p8, %p1111_p5 }
  0x32   :  { %1121 = shalt.err (!%p1118_p9)
}
  0x33   :  { %s1201_s7 = smov 128   ;;  %s1202_s13 = smov 8  }
  0x34   :  { %33 = dma.hbm_to_vmem [thread:$0]  %s1408_s1, 1024, %s28_s15, [#allocation3], %s1201_s7, %s1201_s7, %s1202_s13  }
  0x35   :  { %s1203_s21 = smov [#allocation7]   ;;  %s1204_s23 = smov [#allocation10]  }
  0x36   :  { %s55_s22 = sshll.u32 %s1203_s21, 4  ;;  %s83_s3 = sshll.u32 %s1204_s23, 4  ;;  %s56_s22 = int_to_ptr.vmem [resolvable:$true] %s55_s22  ;;  %s84_s3 = int_to_ptr.vmem [resolvable:$true] %s83_s3 }
  0x37   :  { %s1122_s25 = scalar_lea.hbm %s1412_s5, 1024 }
  0x38   :  { %p1123_p10 = scmp.ne.s32.totalorder %s1412_s5, %s1122_s25  ;;  %p1126_p11 = scmp.lt.u32.totalorder %s1122_s25, %s1412_s5 }
  0x3a   :  { %p1128_p12 = pnand %p1126_p11, %p1123_p10 }
  0x3c   :  { %1131 = shalt.err (!%p1128_p12)
}
  0x3d   :  { %s1132_s1 = scalar_lea.vmem %s56_s22, 1024  ;;  %p1137_p0 = scmp.lt.s32.totalorder %s56_s22, %s56_s22 }
  0x3e   :  { %p1133_p13 = scmp.ne.s32.totalorder %s56_s22, %s1132_s1  ;;  %p1138_p1 = scmp.lt.s32.totalorder %s1132_s1, %s1132_s1 }
  0x40   :  { %p1139_p2 = por %p1138_p1, %p1137_p0 }
  0x42   :  { %p1140_p3 = pnand %p1139_p2, %p1133_p13 }
  0x44   :  { %1143 = shalt.err (!%p1140_p3)
}
  0x45   :  { %61 = dma.hbm_to_vmem [thread:$0]  %s1412_s5, 1024, %s56_s22, [#allocation6], %s1197_s27, %s1197_s27, %s1198_s28  }
  0x46   :  { %s1144_s7 = scalar_lea.hbm %s1416_s9, 1024 }
  0x47   :  { %p1145_p4 = scmp.ne.s32.totalorder %s1416_s9, %s1144_s7  ;;  %p1148_p5 = scmp.lt.u32.totalorder %s1144_s7, %s1416_s9 }
  0x49   :  { %p1150_p6 = pnand %p1148_p5, %p1145_p4 }
  0x4b   :  { %1153 = shalt.err (!%p1150_p6)
}
  0x4c   :  { %s1154_s23 = scalar_lea.vmem %s84_s3, 1024  ;;  %p1159_p8 = scmp.lt.s32.totalorder %s84_s3, %s84_s3 }
  0x4d   :  { %p1155_p7 = scmp.ne.s32.totalorder %s84_s3, %s1154_s23  ;;  %p1160_p9 = scmp.lt.s32.totalorder %s1154_s23, %s1154_s23 }
  0x4f   :  { %p1161_p10 = por %p1160_p9, %p1159_p8 }
  0x51   :  { %p1162_p11 = pnand %p1161_p10, %p1155_p7 }
  0x53   :  { %1165 = shalt.err (!%p1162_p11)
}
  0x54   :  { %89 = dma.hbm_to_vmem [thread:$0]  %s1416_s9, 1024, %s84_s3, [#allocation9], %s1197_s27, %s1197_s27, %s1198_s28  }
  0x55   :  { %1188 = dma.done.wait [#allocation3], 1024  }
  0x56   :  { %1189 = vsyncadd [#allocation3], 4294966272 }
  0x57   :  { %1190 = dma.done.wait [#allocation6], 3072  }
  0x58   :  { %1191 = vsyncadd [#allocation6], 4294964224 }
  0x59   :  { %1192 = dma.done.wait [#allocation9], 2048  }
  0x5a   :  { %1193 = vsyncadd [#allocation9], 4294965248  ;;  %v1205_v0 = vmov 0   ;;  %v996_v1 = vld [vmem:[#allocation2 + $0x4] ss:$8 sps:$4 sm:$0xff]   ;;  %v108_v12 = vld [vmem:[%s1407_s0] sm:$0xff]  ;;  %v121_v34 = vlaneseq }
  0x5b   :  { %207 = vmatprep.mubr.bf16.mxu0 %v1205_v0  ;;  %v998_v2 = vld [vmem:[#allocation2] ss:$8 sps:$4 sm:$0xff]   ;;  %175 = vmatprep.subr.bf16.mxu0 %v996_v1  ;;  %v999_v3 = vld [vmem:[#allocation2 + $0x14] ss:$8 sps:$4 sm:$0xff]   ;;  %v1001_v4 = vld [vmem:[#allocation2 + $0x10] ss:$8 sps:$4 sm:$0xff]  }
  0x5c   :  { %176 = vmatpush1.bf16.msra.mxu0 %v998_v2  ;;  %v1002_v5 = vld [vmem:[#allocation2 + $0x24] ss:$8 sps:$4 sm:$0xff]   ;;  %v1004_v6 = vld [vmem:[#allocation2 + $0x20] ss:$8 sps:$4 sm:$0xff]   ;;  %v1005_v7 = vld [vmem:[#allocation2 + $0x34] ss:$8 sps:$4 sm:$0xff]  }
  0x5d   :  { %177 = vmatprep.subr.bf16.mxu0 %v999_v3  ;;  %v1008_v8 = vld [vmem:[#allocation5 + $0x40] sm:$0xff]   ;;  %v1010_v10 = vld [vmem:[#allocation5 + $0x48] sm:$0xff]   ;;  %v1007_v11 = vld [vmem:[#allocation2 + $0x30] ss:$8 sps:$4 sm:$0xff]   ;;  %vm171_vm0 = vcmask 523264   ;;  %v1206_v29 = vmov 0.0  }
  0x5e   :  { %v1009_v9 = vld [vmem:[#allocation5] sm:$0xff]   ;;  %874 = vmatprep.subr.bf16.mxu1 %v1008_v8  ;;  %v1011_v13 = vld [vmem:[#allocation5 + $0x8] sm:$0xff]   ;;  %v1012_v14 = vld [vmem:[#allocation5 + $0x50] sm:$0xff]   ;;  %v122_v35 = vshrl.u32 %v121_v34, 7  ;;  %vm1207_vm5 = vmmov 0  }
  0x5f   :  { %875 = vmatpush3.bf16.msra.mxu1 %v1009_v9  ;;  %v109_v15 = vld [vmem:[%s1407_s0 + $0x8] sm:$0xff]  ;;  %v1013_v16 = vld [vmem:[#allocation5 + $0x10] sm:$0xff]   ;;  %v1016_v20 = vld [vmem:[#allocation5 + $0x60] sm:$0xff]  }
  0x60   :  { %178 = vmatpush1.bf16.msra.mxu0 %v1001_v4  ;;  %876 = vmatprep.subr.bf16.mxu1 %v1010_v10  ;;  %v110_v17 = vpack.c.bf16 %v109_v15, %v108_v12  ;;  %v1014_v18 = vld [vmem:[#allocation5 + $0x58] sm:$0xff]   ;;  %v1017_v21 = vld [vmem:[#allocation5 + $0x20] sm:$0xff]   ;;  %v1018_v22 = vld [vmem:[#allocation5 + $0x68] sm:$0xff]   ;;  %v123_v36 = vsub.s32 0, %v122_v35  ;;  %v127_v38 = vsub.s32 1, %v122_v35 }
  0x61   :  { %179 = vmatprep.subr.bf16.mxu0 %v1002_v5  ;;  %v1015_v19 = vld [vmem:[#allocation5 + $0x18] sm:$0xff]   ;;  %v1019_v23 = vld [vmem:[#allocation5 + $0x28] sm:$0xff]   ;;  %v1020_v24 = vld [vmem:[#allocation5 + $0x70] sm:$0xff]  }
  0x62   :  { %v1021_v25 = vld [vmem:[#allocation5 + $0x30] sm:$0xff]   ;;  %v1022_v26 = vld [vmem:[#allocation5 + $0x78] sm:$0xff]   ;;  %v1024_v28 = vld [vmem:[#allocation7] sm:$0xff]  }
  0x63   :  { %877 = vmatpush3.bf16.msra.mxu1 %v1011_v13  ;;  %v1023_v27 = vld [vmem:[#allocation5 + $0x38] sm:$0xff]   ;;  %v1025_v30 = vld [vmem:[#allocation7 + $0x8] sm:$0xff]   ;;  %v1026_v31 = vld [vmem:[#allocation7 + $0x10] sm:$0xff]  }
  0x64   :  { %180 = vmatpush1.bf16.msra.mxu0 %v1004_v6  ;;  %878 = vmatprep.subr.bf16.mxu1 %v1012_v14  ;;  %v1027_v32 = vld [vmem:[#allocation7 + $0x18] sm:$0xff]   ;;  %v1028_v33 = vld [vmem:[#allocation7 + $0x20] sm:$0xff]   ;;  %v119_v37 = vld [vmem:[%s1409_s2] sm:$0x3] }
  0x65   :  { %181 = vmatprep.subr.bf16.mxu0 %v1005_v7  ;;  %v124_v39 = vrot.slane %v119_v37, %v123_v36  ;;  %v128_v40 = vrot.slane %v119_v37, %v127_v38  ;;  %v1029_v59 = vld [vmem:[#allocation7 + $0x28] sm:$0xff]   ;;  %v1030_v60 = vld [vmem:[#allocation7 + $0x30] sm:$0xff]   ;;  %v1031_v61 = vld [vmem:[#allocation7 + $0x38] sm:$0xff]  }
  0x66   :  { %v1032_v62 = vld [vmem:[#allocation8] sm:$0xff]   ;;  %v1033_v63 = vld [vmem:[#allocation8 + $0x8] sm:$0xff]   ;;  %v1034_v0 = vld [vmem:[#allocation8 + $0x10] sm:$0xff]  }
  0x67   :  { %879 = vmatpush3.bf16.msra.mxu1 %v1013_v16  ;;  %v1035_v1 = vld [vmem:[#allocation8 + $0x18] sm:$0xff]   ;;  %v1036_v2 = vld [vmem:[#allocation8 + $0x20] sm:$0xff]   ;;  %v1037_v3 = vld [vmem:[#allocation8 + $0x28] sm:$0xff]  }
  0x68   :  { %182 = vmatpush1.bf16.msra.mxu0 %v1007_v11  ;;  %880 = vmatprep.subr.bf16.mxu1 %v1014_v18  ;;  %v821_v5 = vld [vmem:[%s1411_s4] ss:$0 sm:$0xff] }
  0x69   :  { %923 = vmatprep.subr.bf16.mxu0 %v1206_v29  ;;  %v1038_v18 = vld [vmem:[#allocation8 + $0x30] sm:$0xff]  }
  0x6b   :  { %820 = vmatmul.mubr.msk.bf16.vlgmr.msra.gmra.mrb[0].mxu0 %vm171_vm0, %v110_v17  ;;  %881 = vmatpush3.bf16.msra.mxu1 %v1015_v19  ;;  %v1039_v19 = vld [vmem:[#allocation8 + $0x38] sm:$0xff]  }
  0x6c   :  { %882 = vmatprep.subr.bf16.mxu1 %v1016_v20  ;;  %924 = vmatpush3.bf16.msra.mxu0 %v1024_v28  ;;  %v1040_v20 = vld [vmem:[#allocation10] sm:$0xff]  }
  0x6d   :  { %925 = vmatprep.subr.bf16.mxu0 %v1206_v29  ;;  %939 = vmatprep.mubr.msk.bf16.mxu0 %vm1207_vm5, %v1206_v29 }
  0x6f   :  { %883 = vmatpush3.bf16.msra.mxu1 %v1017_v21  ;;  %v1041_v21 = vld [vmem:[#allocation10 + $0x8] sm:$0xff]  }
  0x70   :  { %884 = vmatprep.subr.bf16.mxu1 %v1018_v22  ;;  %926 = vmatpush3.bf16.msra.mxu0 %v1025_v30  ;;  %v1042_v22 = vld [vmem:[#allocation10 + $0x10] sm:$0xff]  }
  0x71   :  { %927 = vmatprep.subr.bf16.mxu0 %v1206_v29 }
  0x73   :  { %885 = vmatpush3.bf16.msra.mxu1 %v1019_v23  ;;  %v1043_v23 = vld [vmem:[#allocation10 + $0x18] sm:$0xff]  }
  0x74   :  { %886 = vmatprep.subr.bf16.mxu1 %v1020_v24  ;;  %928 = vmatpush3.bf16.msra.mxu0 %v1026_v31  ;;  %v1044_v24 = vld [vmem:[#allocation10 + $0x20] sm:$0xff]  }
  0x75   :  { %929 = vmatprep.subr.bf16.mxu0 %v1206_v29 }
  0x77   :  { %887 = vmatpush3.bf16.msra.mxu1 %v1021_v25  ;;  %v1045_v25 = vld [vmem:[#allocation10 + $0x28] sm:$0xff]  }
  0x78   :  { %888 = vmatprep.subr.bf16.mxu1 %v1022_v26  ;;  %930 = vmatpush3.bf16.msra.mxu0 %v1027_v32  ;;  %v838_v26 = vld [vmem:[%s1413_s6] ss:$0 sm:$0xff] }
  0x79   :  { %931 = vmatprep.subr.bf16.mxu0 %v1206_v29 }
  0x7b   :  { %889 = vmatpush3.bf16.msra.mxu1 %v1023_v27 }
  0x7c   :  { %943 = vmatprep.subr.bf16.mxu1 %v1206_v29  ;;  %932 = vmatpush3.bf16.msra.mxu0 %v1028_v33 }
  0x7d   :  { %933 = vmatprep.subr.bf16.mxu0 %v1206_v29 }
  0x80   :  { %934 = vmatpush3.bf16.msra.mxu0 %v1029_v59 }
  0x81   :  { %935 = vmatprep.subr.bf16.mxu0 %v1206_v29 }
  0x84   :  { %936 = vmatpush3.bf16.msra.mxu0 %v1030_v60 }
  0x85   :  { %937 = vmatprep.subr.bf16.mxu0 %v1206_v29 }
  0x88   :  { %938 = vmatpush3.bf16.msra.mxu0 %v1031_v61 }
  0x89   :  { %963 = vmatprep.subr.bf16.mxu0 %v1206_v29 }
 0x13e   :  { %v209_v41 = vpop.f32.mrb[0].mxu0 }
 0x13f   :  { %v210_v42 = vadd.f32 %v209_v41, %v124_v39  ;;  %v211_v43 = vpop.f32.mrb[1].mxu0  ;;  %v847_v41 = vld [vmem:[%s1415_s8] ss:$0 sm:$0xff]  ;;  %s1208_s8 = smov [#allocation11]  }
 0x140   :  { %v212_v44 = vadd.f32 %v211_v43, %v128_v40  ;;  %v213_v45 = vpop.f32.mrb[2].mxu0 }
 0x141   :  { %v222_v46 = vmul.f32 0.01, %v210_v42  ;;  %v214_v47 = vadd.f32 %v213_v45, %v124_v39  ;;  %v215_v48 = vpop.f32.mrb[3].mxu0  ;;  %vm218_vm1 = vcmp.gt.f32.partialorder %v210_v42, 0.0  ;;  %v1046_v39 = vld [vmem:[#allocation10 + $0x30] sm:$0xff]  }
 0x142   :  { %v223_v49 = vmul.f32 0.01, %v212_v44  ;;  %v216_v50 = vadd.f32 %v215_v48, %v128_v40  ;;  %vm219_vm3 = vcmp.gt.f32.partialorder %v212_v44, 0.0  ;;  %v1047_v40 = vld [vmem:[#allocation10 + $0x38] sm:$0xff]  }
 0x143   :  { %vm220_vm2 = vcmp.gt.f32.partialorder %v214_v47, 0.0  ;;  %v224_v51 = vmul.f32 0.01, %v214_v47  ;;  %v226_v53 = vsel %vm218_vm1, %v210_v42, %v222_v46 }
 0x144   :  { %v225_v52 = vmul.f32 0.01, %v216_v50  ;;  %vm221_vm4 = vcmp.gt.f32.partialorder %v216_v50, 0.0  ;;  %v227_v55 = vsel %vm219_vm3, %v212_v44, %v223_v49 }
 0x145   :  { %v228_v54 = vsel %vm220_vm2, %v214_v47, %v224_v51 }
 0x146   :  { %v229_v56 = vsel %vm221_vm4, %v216_v50, %v225_v52  ;;  %v230_v57 = vpack.c.bf16 %v228_v54, %v226_v53 }
 0x147   :  { %v231_v58 = vpack.c.bf16 %v229_v56, %v227_v55 }
 0x149   :  { %399 = vmatprep.mubr.bf16.mxu1 %v231_v58 }
 0x14a   :  { %400 = vmatmul.mubr.bf16.vlgmr.msra.gmra.mrb[0].mxu1 %v230_v57 }
 0x14b   :  { %959 = vmatprep.mubr.msk.bf16.mxu1 %vm1207_vm5, %v1206_v29  ;;  %944 = vmatpush3.bf16.msra.mxu1 %v1032_v62 }
 0x14c   :  { %945 = vmatprep.subr.bf16.mxu1 %v1206_v29 }
 0x14f   :  { %946 = vmatpush3.bf16.msra.mxu1 %v1033_v63 }
 0x150   :  { %947 = vmatprep.subr.bf16.mxu1 %v1206_v29 }
 0x153   :  { %948 = vmatpush3.bf16.msra.mxu1 %v1034_v0 }
 0x154   :  { %949 = vmatprep.subr.bf16.mxu1 %v1206_v29 }
 0x157   :  { %950 = vmatpush3.bf16.msra.mxu1 %v1035_v1 }
 0x158   :  { %951 = vmatprep.subr.bf16.mxu1 %v1206_v29 }
 0x15b   :  { %952 = vmatpush3.bf16.msra.mxu1 %v1036_v2 }
 0x15c   :  { %953 = vmatprep.subr.bf16.mxu1 %v1206_v29 }
 0x15f   :  { %954 = vmatpush3.bf16.msra.mxu1 %v1037_v3 }
 0x160   :  { %955 = vmatprep.subr.bf16.mxu1 %v1206_v29 }
 0x163   :  { %956 = vmatpush3.bf16.msra.mxu1 %v1038_v18 }
 0x164   :  { %957 = vmatprep.subr.bf16.mxu1 %v1206_v29 }
 0x167   :  { %958 = vmatpush3.bf16.msra.mxu1 %v1039_v19 }
 0x21d   :  { %v890_v4 = vpop.f32.mrb[0].mxu1 }
 0x21e   :  { %v891_v6 = vpop.f32.mrb[1].mxu1 }
 0x21f   :  { %v892_v7 = vadd.f32 %v891_v6, %v890_v4  ;;  %v893_v8 = vpop.f32.mrb[2].mxu1 }
 0x220   :  { %v894_v9 = vpop.f32.mrb[3].mxu1 }
 0x221   :  { %v402_v10 = vadd.f32 %v892_v7, %v821_v5  ;;  %v895_v11 = vadd.f32 %v894_v9, %v893_v8 }
 0x223   :  { %v410_v12 = vmul.f32 0.01, %v402_v10  ;;  %v405_v13 = vadd.f32 %v895_v11, %v821_v5  ;;  %vm408_vm6 = vcmp.gt.f32.partialorder %v402_v10, 0.0 }
 0x225   :  { %vm409_vm7 = vcmp.gt.f32.partialorder %v405_v13, 0.0  ;;  %v411_v14 = vmul.f32 0.01, %v405_v13  ;;  %v412_v15 = vsel %vm408_vm6, %v402_v10, %v410_v12 }
 0x227   :  { %v413_v16 = vsel %vm409_vm7, %v405_v13, %v411_v14 }
 0x228   :  { %v414_v17 = vpack.c.bf16 %v413_v16, %v412_v15 }
 0x22a   :  { %940 = vmatmul.mubr.bf16.vlgmr.msra.gmra.mrb[4].mxu0 %v414_v17 }
 0x22b   :  { %979 = vmatprep.mubr.msk.bf16.mxu0 %vm1207_vm5, %v1206_v29  ;;  %964 = vmatpush3.bf16.msra.mxu0 %v1040_v20 }
 0x22c   :  { %965 = vmatprep.subr.bf16.mxu0 %v1206_v29 }
 0x22f   :  { %966 = vmatpush3.bf16.msra.mxu0 %v1041_v21 }
 0x230   :  { %967 = vmatprep.subr.bf16.mxu0 %v1206_v29 }
 0x233   :  { %968 = vmatpush3.bf16.msra.mxu0 %v1042_v22 }
 0x234   :  { %969 = vmatprep.subr.bf16.mxu0 %v1206_v29 }
 0x237   :  { %970 = vmatpush3.bf16.msra.mxu0 %v1043_v23 }
 0x238   :  { %971 = vmatprep.subr.bf16.mxu0 %v1206_v29 }
 0x23b   :  { %972 = vmatpush3.bf16.msra.mxu0 %v1044_v24 }
 0x23c   :  { %973 = vmatprep.subr.bf16.mxu0 %v1206_v29 }
 0x23f   :  { %974 = vmatpush3.bf16.msra.mxu0 %v1045_v25 }
 0x240   :  { %975 = vmatprep.subr.bf16.mxu0 %v1206_v29 }
 0x243   :  { %976 = vmatpush3.bf16.msra.mxu0 %v1046_v39 }
 0x244   :  { %977 = vmatprep.subr.bf16.mxu0 %v1206_v29  ;;  %v856_v29 = vld [vmem:[%s1417_s10] ss:$0 sm:$0xff]  ;;  %s798_s10 = sshll.u32 %s1208_s8, 4  ;;  %s799_s10 = int_to_ptr.vmem [resolvable:$true] %s798_s10 }
 0x245   :  { %s1166_s15 = scalar_lea.vmem %s799_s10, 128  ;;  %p1171_p13 = scmp.lt.s32.totalorder %s799_s10, %s799_s10 }
 0x246   :  { %p1167_p12 = scmp.ne.s32.totalorder %s799_s10, %s1166_s15  ;;  %p1172_p0 = scmp.lt.s32.totalorder %s1166_s15, %s1166_s15 }
 0x247   :  { %978 = vmatpush3.bf16.msra.mxu0 %v1047_v40 }
 0x248   :  { %p1173_p1 = por %p1172_p0, %p1171_p13 }
 0x24a   :  { %p1174_p2 = pnand %p1173_p1, %p1167_p12 }
 0x2fd   :  { %v520_v27 = vpop.f32.mrb[4].mxu0 }
 0x2fe   :  { %v521_v28 = vadd.f32 %v838_v26, %v520_v27  ;;  %v941_v30 = vpop.f32.mrb[5].mxu0 }
 0x2ff   :  { %v523_v31 = vpop.f32.mrb[6].mxu0 }
 0x300   :  { %v529_v32 = vmul.f32 0.01, %v521_v28  ;;  %v524_v33 = vadd.f32 %v838_v26, %v523_v31  ;;  %v942_v34 = vpop.f32.mrb[7].mxu0  ;;  %vm527_vm8 = vcmp.gt.f32.partialorder %v521_v28, 0.0 }
 0x302   :  { %vm528_vm9 = vcmp.gt.f32.partialorder %v524_v33, 0.0  ;;  %v530_v35 = vmul.f32 0.01, %v524_v33  ;;  %v531_v36 = vsel %vm527_vm8, %v521_v28, %v529_v32 }
 0x304   :  { %v532_v37 = vsel %vm528_vm9, %v524_v33, %v530_v35 }
 0x305   :  { %v533_v38 = vpack.c.bf16 %v532_v37, %v531_v36 }
 0x307   :  { %960 = vmatmul.mubr.bf16.vlgmr.msra.gmra.mrb[4].mxu1 %v533_v38 }
 0x3da   :  { %v639_v42 = vpop.f32.mrb[4].mxu1 }
 0x3db   :  { %v640_v43 = vadd.f32 %v847_v41, %v639_v42  ;;  %v961_v44 = vpop.f32.mrb[5].mxu1 }
 0x3dc   :  { %v642_v45 = vpop.f32.mrb[6].mxu1 }
 0x3dd   :  { %v648_v46 = vmul.f32 0.01, %v640_v43  ;;  %v643_v47 = vadd.f32 %v847_v41, %v642_v45  ;;  %v962_v48 = vpop.f32.mrb[7].mxu1  ;;  %vm646_vm10 = vcmp.gt.f32.partialorder %v640_v43, 0.0 }
 0x3df   :  { %vm647_vm11 = vcmp.gt.f32.partialorder %v643_v47, 0.0  ;;  %v649_v49 = vmul.f32 0.01, %v643_v47  ;;  %v650_v50 = vsel %vm646_vm10, %v640_v43, %v648_v46 }
 0x3e1   :  { %v651_v51 = vsel %vm647_vm11, %v643_v47, %v649_v49 }
 0x3e2   :  { %v652_v52 = vpack.c.bf16 %v651_v51, %v650_v50 }
 0x3e4   :  { %980 = vmatmul.mubr.bf16.vlgmr.msra.gmra.mrb[8].mxu0 %v652_v52 }
 0x4b7   :  { %v758_v53 = vpop.f32.mrb[8].mxu0 }
 0x4b8   :  { %v759_v54 = vadd.f32 %v856_v29, %v758_v53  ;;  %v981_v55 = vpop.f32.mrb[9].mxu0 }
 0x4b9   :  { %v761_v56 = vpop.f32.mrb[10].mxu0 }
 0x4ba   :  { %765 = vmax.xlane.f32.xlu0 %v759_v54  ;;  %v982_v57 = vpop.f32.mrb[11].mxu0  ;;  %v762_v58 = vadd.f32 %v856_v29, %v761_v56 }
 0x4be   :  { %767 = vmax.xlane.f32.xlu0 %v762_v58 }
 0x547   :  { %v766_v59 = vpop.xlane.xlu0 %765 }
 0x548   :  { %v769_v60 = vsub.f32 %v759_v54, %v766_v59 }
 0x54a   :  { %v771_v61 = vmul.f32 1.442695, %v769_v60 }
 0x54b   :  { %v768_v62 = vpop.xlane.xlu0 %767 }
 0x54c   :  { %1048 = vpow2.f32 %v771_v61  ;;  %v770_v63 = vsub.f32 %v762_v58, %v768_v62 }
 0x54e   :  { %v773_v0 = vmul.f32 1.442695, %v770_v63 }
 0x550   :  { %1050 = vpow2.f32 %v773_v0 }
 0x556   :  { %v1049_v1 = vpop.eup %1048 }
 0x557   :  { %775 = vadd.xlane.f32.xlu1 %v1049_v1 }
 0x55a   :  { %v1051_v2 = vpop.eup %1050 }
 0x55b   :  { %777 = vadd.xlane.f32.xlu1 %v1051_v2 }
 0x5e4   :  { %v776_v3 = vpop.xlane.xlu1 %775 }
 0x5e5   :  { %1052 = vrcp.f32 %v776_v3 }
 0x5e8   :  { %v778_v4 = vpop.xlane.xlu1 %777 }
 0x5e9   :  { %1054 = vrcp.f32 %v778_v4 }
 0x5ef   :  { %v1053_v5 = vpop.eup %1052 }
 0x5f0   :  { %v781_v7 = vmul.f32 %v1053_v5, %v1049_v1 }
 0x5f3   :  { %v1055_v6 = vpop.eup %1054 }
 0x5f4   :  { %v782_v8 = vmul.f32 %v1055_v6, %v1051_v2 }
 0x5f6   :  { %v872_v9 = vpack.c.bf16 %v782_v8, %v781_v7 }
 0x5f8   :  { %873 = vst [vmem:[#allocation11] sm:$0xff] %v872_v9  }
 0x5f9   :  { %1177 = shalt.err (!%p1174_p2)
}
 0x5fa   :  { %s1178_s17 = scalar_lea.hbm %s1418_s11, 128 }
 0x5fb   :  { %p1179_p3 = scmp.ne.s32.totalorder %s1418_s11, %s1178_s17  ;;  %p1182_p4 = scmp.lt.u32.totalorder %s1178_s17, %s1418_s11 }
 0x5fd   :  { %p1184_p5 = pnand %p1182_p4, %p1179_p3 }
 0x5ff   :  { %1187 = shalt.err (!%p1184_p5)
}
 0x600   :  { %804 = dma.vmem_to_hbm [thread:$0]  %s799_s10, 128, %s1418_s11, [#allocation4], %s1197_s27, %s1197_s27, %s1198_s28  }
 0x601   :  { %1194 = dma.done.wait [#allocation4], 128  }
 0x602   :  { %1195 = vsyncadd [#allocation4], 4294967168 }
 0x603   :  { %808 = vsyncpa [#allocation3], 1 }
 0x604   :  { %809 = vsyncpa [#allocation6], 1 }
 0x605   :  { %810 = vsyncpa [#allocation9], 1 }
 0x606   :  { %811 = vsyncpa [#allocation4], 1 }

</bundles_post_ra>
